<compile_context>
chip_gen: v6e
topology: v6e:2x2x1
jax: 0.10.0
libtpu: 0.0.40
codegen_flags: <defaults>
</compile_context>

<pallas_src>
import math

import jax
import jax.numpy as jnp
from jax import lax
from jax.experimental import pallas as pl
from jax.experimental.pallas import tpu as pltpu

_NUM_CLASS = 2       # the PyTorch module hardcodes self.num_class = 2
_RIDGE = 0.0005
_LOSS_EPS = 1e-6


def _hloss_classwise_kernel(x_ref, label_ref, loss_ref):
    """Fused forward pass.

    x_ref     : (N, D) float32 features            (VMEM)
    label_ref : (N, 1) int32 labels in {0..C-1}    (VMEM)
    loss_ref  : (1, 1) float32 output loss         (VMEM)
    """
    x = x_ref[...]                                    # (N, D)
    lbl = label_ref[...]                              # (N, 1)
    d = x.shape[1]
    hi = lax.Precision.HIGHEST

    # Ridge identity + row-index helper, built once in-kernel (ridge fusion).
    eye = (lax.broadcasted_iota(jnp.int32, (d, d), 0) ==
           lax.broadcasted_iota(jnp.int32, (d, d), 1)).astype(jnp.float32)
    row_idx = lax.broadcasted_iota(jnp.int32, (d, 1), 0)

    ent_const = 0.5 * d * (1.0 + math.log(2.0 * math.pi))   # Python constant

    def neg_entropy(cls):
        # Two-pass (torch.cov-exact) per-class covariance.  The max() guards
        # only fire for degenerate classes (<2 samples), where the PyTorch
        # reference would produce NaN/inf anyway.
        m = (lbl == cls).astype(jnp.float32)                 # (N, 1) mask
        n = jnp.sum(m, axis=0, keepdims=True)                # (1, 1) count
        s = jnp.sum(x * m, axis=0, keepdims=True)            # (1, D) class sum
        mu = s / jnp.maximum(n, 1.0)                         # (1, D) class mean
        xc = (x - mu) * m                                    # (N, D) masked deviations
        cov = lax.dot_general(xc, xc, (((0,), (0,)), ((), ())),
                              precision=hi,
                              preferred_element_type=jnp.float32)
        cov = cov / jnp.maximum(n - 1.0, 1.0) + _RIDGE * eye  # (D, D) SPD

        # log|cov| via fully unrolled Gaussian elimination (no pivoting needed
        # for an SPD matrix); stays in vector ops, no scalar extraction.
        # TODO(synk): for large D, fall back to emitting the (C, D, D)
        # covariances and jnp.linalg.slogdet outside the kernel.
        a = cov
        logdet = jnp.zeros((1, 1), jnp.float32)
        for k in range(d):
            pivot = a[k:k + 1, k:k + 1]                      # (1, 1)
            logdet = logdet + jnp.log(pivot)
            factor = jnp.where(row_idx > k, a[:, k:k + 1] / pivot, 0.0)
            a = a - factor * a[k:k + 1, :]

        # -MultivariateNormal(mu_l, cov_l).entropy()
        return -(ent_const + 0.5 * logdet)                   # (1, 1)

    acc = neg_entropy(0)
    for cls in range(1, _NUM_CLASS):
        acc = acc + neg_entropy(cls)
    entropy = acc / float(_NUM_CLASS)
    loss_ref[...] = 1.0 / (entropy + _LOSS_EPS)


def hloss_classwise(in_feature, label):
    """Matches HLoss_classwise.forward for labels in {0, 1}."""
    n = in_feature.shape[0]
    # TODO(synk): production-size N needs a trailing "arbitrary" sample-axis
    # reduction grid with a lane-padded VMEM accumulator (and on v7x a leading
    # core-parallel split + vmem_limit_bytes sized for 64 MiB); at these
    # shapes the whole problem is a single VMEM block.
    out = pl.pallas_call(
        _hloss_classwise_kernel,
        out_shape=jax.ShapeDtypeStruct((1, 1), jnp.float32),
        in_specs=[
            pl.BlockSpec(memory_space=pltpu.MemorySpace.VMEM),   # features
            pl.BlockSpec(memory_space=pltpu.MemorySpace.VMEM),   # labels
        ],
        out_specs=pl.BlockSpec(memory_space=pltpu.MemorySpace.VMEM),
    )(in_feature.astype(jnp.float32),
      label.reshape(n, 1).astype(jnp.int32))
    return out[0, 0]


def _hloss_classwise_ref(in_feature, label):
    """Pure-JAX reference (mirrors the PyTorch module) for validation."""
    x = in_feature.astype(jnp.float32)
    d = x.shape[1]
    ent = jnp.float32(0.0)
    for cls in range(_NUM_CLASS):
        m = (label == cls).astype(jnp.float32)[:, None]
        cnt = jnp.sum(m)
        mu = jnp.sum(x * m, axis=0) / cnt
        xc = (x - mu) * m
        cov = xc.T @ xc / (cnt - 1.0) + _RIDGE * jnp.eye(d, dtype=jnp.float32)
        _, logdet = jnp.linalg.slogdet(cov)
        ent = ent - (0.5 * d * (1.0 + jnp.log(2.0 * jnp.pi)) + 0.5 * logdet)
    ent = ent / _NUM_CLASS
    return 1.0 / (ent + _LOSS_EPS)


if __name__ == "__main__":
    key = jax.random.PRNGKey(0)
    N, D = 16, 8                     # N samples, D-dim features; 2 classes
    in_feature = jax.random.normal(key, (N, D), dtype=jnp.float32)
    label = jnp.arange(N, dtype=jnp.int32) % _NUM_CLASS   # balanced classes

    loss = hloss_classwise(in_feature, label)
    jax.block_until_ready(loss)

    ref = _hloss_classwise_ref(in_feature, label)
    if not bool(jnp.allclose(loss, ref, rtol=5e-3, atol=1e-5)):
        raise AssertionError(f"kernel {loss} != reference {ref}")
    print("KERNEL_OK")
</pallas_src>

<mosaic_0001>
module attributes {stable_mosaic.version = 11 : i64} {
  func.func @_hloss_classwise_kernel(%arg0: memref<16x8xf32, #tpu.memory_space<vmem>>, %arg1: memref<16x1xi32, #tpu.memory_space<vmem>>, %arg2: memref<1x1xf32, #tpu.memory_space<vmem>>) attributes {dimension_semantics = [], scalar_prefetch = 0 : i64, scratch_operands = 0 : i64, tpu.core_type = #tpu.core_type<tc>} {
    %c0 = arith.constant 0 : index
    %c0_0 = arith.constant 0 : index
    %0 = vector.load %arg0[%c0, %c0_0] : memref<16x8xf32, #tpu.memory_space<vmem>>, vector<16x8xf32>
    %c0_1 = arith.constant 0 : index
    %c0_2 = arith.constant 0 : index
    %1 = vector.load %arg1[%c0_1, %c0_2] : memref<16x1xi32, #tpu.memory_space<vmem>>, vector<16x1xi32>
    %2 = tpu.iota {dimensions = array<i32: 0>} : vector<8x8xi32>
    %3 = tpu.iota {dimensions = array<i32: 1>} : vector<8x8xi32>
    %4 = arith.cmpi eq, %2, %3 : vector<8x8xi32>
    %5 = arith.extui %4 : vector<8x8xi1> to vector<8x8xi32>
    %6 = arith.sitofp %5 : vector<8x8xi32> to vector<8x8xf32>
    %7 = tpu.iota {dimensions = array<i32: 0>} : vector<8x1xi32>
    %c0_i32 = arith.constant 0 : i32
    %8 = vector.broadcast %c0_i32 : i32 to vector<16x1xi32>
    %9 = arith.cmpi eq, %1, %8 : vector<16x1xi32>
    %10 = arith.extui %9 : vector<16x1xi1> to vector<16x1xi32>
    %11 = arith.sitofp %10 : vector<16x1xi32> to vector<16x1xf32>
    %cst = arith.constant dense<0.000000e+00> : vector<1xf32>
    %12 = vector.multi_reduction <add>, %11, %cst [0] : vector<16x1xf32> to vector<1xf32>
    %13 = vector.shape_cast %12 : vector<1xf32> to vector<1x1xf32>
    %14 = vector.broadcast %11 : vector<16x1xf32> to vector<16x8xf32>
    %15 = arith.mulf %0, %14 : vector<16x8xf32>
    %cst_3 = arith.constant dense<0.000000e+00> : vector<8xf32>
    %16 = vector.multi_reduction <add>, %15, %cst_3 [0] : vector<16x8xf32> to vector<8xf32>
    %17 = vector.shape_cast %16 : vector<8xf32> to vector<1x8xf32>
    %cst_4 = arith.constant 1.000000e+00 : f32
    %18 = vector.broadcast %cst_4 : f32 to vector<1x1xf32>
    %19 = arith.maximumf %13, %18 : vector<1x1xf32>
    %20 = vector.broadcast %19 : vector<1x1xf32> to vector<1x8xf32>
    %21 = arith.divf %17, %20 : vector<1x8xf32>
    %22 = vector.broadcast %21 : vector<1x8xf32> to vector<16x8xf32>
    %23 = arith.subf %0, %22 : vector<16x8xf32>
    %24 = vector.broadcast %11 : vector<16x1xf32> to vector<16x8xf32>
    %25 = arith.mulf %23, %24 : vector<16x8xf32>
    %cst_5 = arith.constant dense<0.000000e+00> : vector<8x8xf32>
    %26 = tpu.matmul %25, %25, %cst_5 {dimension_numbers = #tpu.dot_dimension_numbers<[0], [0], [1], [1], [0, 1, 1, 1], [], []>, precision = #tpu.contract_precision<fp32>} : vector<16x8xf32>, vector<16x8xf32>, vector<8x8xf32> -> vector<8x8xf32>
    %cst_6 = arith.constant 1.000000e+00 : f32
    %27 = vector.broadcast %cst_6 : f32 to vector<1x1xf32>
    %28 = arith.subf %13, %27 : vector<1x1xf32>
    %cst_7 = arith.constant 1.000000e+00 : f32
    %29 = vector.broadcast %cst_7 : f32 to vector<1x1xf32>
    %30 = arith.maximumf %28, %29 : vector<1x1xf32>
    %31 = vector.broadcast %30 : vector<1x1xf32> to vector<8x8xf32>
    %32 = arith.divf %26, %31 : vector<8x8xf32>
    %cst_8 = arith.constant 5.000000e-04 : f32
    %33 = vector.broadcast %cst_8 : f32 to vector<8x8xf32>
    %34 = arith.mulf %33, %6 : vector<8x8xf32>
    %35 = arith.addf %32, %34 : vector<8x8xf32>
    %cst_9 = arith.constant 0.000000e+00 : f32
    %36 = vector.broadcast %cst_9 : f32 to vector<1x1xf32>
    %37 = vector.extract_strided_slice %35 {offsets = [0, 0], sizes = [1, 1], strides = [1, 1]} : vector<8x8xf32> to vector<1x1xf32>
    %38 = math.log %37 : vector<1x1xf32>
    %39 = arith.addf %36, %38 : vector<1x1xf32>
    %c0_i32_10 = arith.constant 0 : i32
    %40 = vector.broadcast %c0_i32_10 : i32 to vector<8x1xi32>
    %41 = arith.cmpi sgt, %7, %40 : vector<8x1xi32>
    %42 = vector.extract_strided_slice %35 {offsets = [0, 0], sizes = [8, 1], strides = [1, 1]} : vector<8x8xf32> to vector<8x1xf32>
    %43 = vector.broadcast %37 : vector<1x1xf32> to vector<8x1xf32>
    %44 = arith.divf %42, %43 : vector<8x1xf32>
    %cst_11 = arith.constant 0.000000e+00 : f32
    %45 = vector.broadcast %cst_11 : f32 to vector<8x1xf32>
    %46 = arith.select %41, %44, %45 : vector<8x1xi1>, vector<8x1xf32>
    %47 = vector.extract_strided_slice %35 {offsets = [0, 0], sizes = [1, 8], strides = [1, 1]} : vector<8x8xf32> to vector<1x8xf32>
    %48 = vector.broadcast %46 : vector<8x1xf32> to vector<8x8xf32>
    %49 = vector.broadcast %47 : vector<1x8xf32> to vector<8x8xf32>
    %50 = arith.mulf %48, %49 : vector<8x8xf32>
    %51 = arith.subf %35, %50 : vector<8x8xf32>
    %52 = vector.extract_strided_slice %51 {offsets = [1, 1], sizes = [1, 1], strides = [1, 1]} : vector<8x8xf32> to vector<1x1xf32>
    %53 = math.log %52 : vector<1x1xf32>
    %54 = arith.addf %39, %53 : vector<1x1xf32>
    %c1_i32 = arith.constant 1 : i32
    %55 = vector.broadcast %c1_i32 : i32 to vector<8x1xi32>
    %56 = arith.cmpi sgt, %7, %55 : vector<8x1xi32>
    %57 = vector.extract_strided_slice %51 {offsets = [0, 1], sizes = [8, 1], strides = [1, 1]} : vector<8x8xf32> to vector<8x1xf32>
    %58 = vector.broadcast %52 : vector<1x1xf32> to vector<8x1xf32>
    %59 = arith.divf %57, %58 : vector<8x1xf32>
    %cst_12 = arith.constant 0.000000e+00 : f32
    %60 = vector.broadcast %cst_12 : f32 to vector<8x1xf32>
    %61 = arith.select %56, %59, %60 : vector<8x1xi1>, vector<8x1xf32>
    %62 = vector.extract_strided_slice %51 {offsets = [1, 0], sizes = [1, 8], strides = [1, 1]} : vector<8x8xf32> to vector<1x8xf32>
    %63 = vector.broadcast %61 : vector<8x1xf32> to vector<8x8xf32>
    %64 = vector.broadcast %62 : vector<1x8xf32> to vector<8x8xf32>
    %65 = arith.mulf %63, %64 : vector<8x8xf32>
    %66 = arith.subf %51, %65 : vector<8x8xf32>
    %67 = vector.extract_strided_slice %66 {offsets = [2, 2], sizes = [1, 1], strides = [1, 1]} : vector<8x8xf32> to vector<1x1xf32>
    %68 = math.log %67 : vector<1x1xf32>
    %69 = arith.addf %54, %68 : vector<1x1xf32>
    %c2_i32 = arith.constant 2 : i32
    %70 = vector.broadcast %c2_i32 : i32 to vector<8x1xi32>
    %71 = arith.cmpi sgt, %7, %70 : vector<8x1xi32>
    %72 = vector.extract_strided_slice %66 {offsets = [0, 2], sizes = [8, 1], strides = [1, 1]} : vector<8x8xf32> to vector<8x1xf32>
    %73 = vector.broadcast %67 : vector<1x1xf32> to vector<8x1xf32>
    %74 = arith.divf %72, %73 : vector<8x1xf32>
    %cst_13 = arith.constant 0.000000e+00 : f32
    %75 = vector.broadcast %cst_13 : f32 to vector<8x1xf32>
    %76 = arith.select %71, %74, %75 : vector<8x1xi1>, vector<8x1xf32>
    %77 = vector.extract_strided_slice %66 {offsets = [2, 0], sizes = [1, 8], strides = [1, 1]} : vector<8x8xf32> to vector<1x8xf32>
    %78 = vector.broadcast %76 : vector<8x1xf32> to vector<8x8xf32>
    %79 = vector.broadcast %77 : vector<1x8xf32> to vector<8x8xf32>
    %80 = arith.mulf %78, %79 : vector<8x8xf32>
    %81 = arith.subf %66, %80 : vector<8x8xf32>
    %82 = vector.extract_strided_slice %81 {offsets = [3, 3], sizes = [1, 1], strides = [1, 1]} : vector<8x8xf32> to vector<1x1xf32>
    %83 = math.log %82 : vector<1x1xf32>
    %84 = arith.addf %69, %83 : vector<1x1xf32>
    %c3_i32 = arith.constant 3 : i32
    %85 = vector.broadcast %c3_i32 : i32 to vector<8x1xi32>
    %86 = arith.cmpi sgt, %7, %85 : vector<8x1xi32>
    %87 = vector.extract_strided_slice %81 {offsets = [0, 3], sizes = [8, 1], strides = [1, 1]} : vector<8x8xf32> to vector<8x1xf32>
    %88 = vector.broadcast %82 : vector<1x1xf32> to vector<8x1xf32>
    %89 = arith.divf %87, %88 : vector<8x1xf32>
    %cst_14 = arith.constant 0.000000e+00 : f32
    %90 = vector.broadcast %cst_14 : f32 to vector<8x1xf32>
    %91 = arith.select %86, %89, %90 : vector<8x1xi1>, vector<8x1xf32>
    %92 = vector.extract_strided_slice %81 {offsets = [3, 0], sizes = [1, 8], strides = [1, 1]} : vector<8x8xf32> to vector<1x8xf32>
    %93 = vector.broadcast %91 : vector<8x1xf32> to vector<8x8xf32>
    %94 = vector.broadcast %92 : vector<1x8xf32> to vector<8x8xf32>
    %95 = arith.mulf %93, %94 : vector<8x8xf32>
    %96 = arith.subf %81, %95 : vector<8x8xf32>
    %97 = vector.extract_strided_slice %96 {offsets = [4, 4], sizes = [1, 1], strides = [1, 1]} : vector<8x8xf32> to vector<1x1xf32>
    %98 = math.log %97 : vector<1x1xf32>
    %99 = arith.addf %84, %98 : vector<1x1xf32>
    %c4_i32 = arith.constant 4 : i32
    %100 = vector.broadcast %c4_i32 : i32 to vector<8x1xi32>
    %101 = arith.cmpi sgt, %7, %100 : vector<8x1xi32>
    %102 = vector.extract_strided_slice %96 {offsets = [0, 4], sizes = [8, 1], strides = [1, 1]} : vector<8x8xf32> to vector<8x1xf32>
    %103 = vector.broadcast %97 : vector<1x1xf32> to vector<8x1xf32>
    %104 = arith.divf %102, %103 : vector<8x1xf32>
    %cst_15 = arith.constant 0.000000e+00 : f32
    %105 = vector.broadcast %cst_15 : f32 to vector<8x1xf32>
    %106 = arith.select %101, %104, %105 : vector<8x1xi1>, vector<8x1xf32>
    %107 = vector.extract_strided_slice %96 {offsets = [4, 0], sizes = [1, 8], strides = [1, 1]} : vector<8x8xf32> to vector<1x8xf32>
    %108 = vector.broadcast %106 : vector<8x1xf32> to vector<8x8xf32>
    %109 = vector.broadcast %107 : vector<1x8xf32> to vector<8x8xf32>
    %110 = arith.mulf %108, %109 : vector<8x8xf32>
    %111 = arith.subf %96, %110 : vector<8x8xf32>
    %112 = vector.extract_strided_slice %111 {offsets = [5, 5], sizes = [1, 1], strides = [1, 1]} : vector<8x8xf32> to vector<1x1xf32>
    %113 = math.log %112 : vector<1x1xf32>
    %114 = arith.addf %99, %113 : vector<1x1xf32>
    %c5_i32 = arith.constant 5 : i32
    %115 = vector.broadcast %c5_i32 : i32 to vector<8x1xi32>
    %116 = arith.cmpi sgt, %7, %115 : vector<8x1xi32>
    %117 = vector.extract_strided_slice %111 {offsets = [0, 5], sizes = [8, 1], strides = [1, 1]} : vector<8x8xf32> to vector<8x1xf32>
    %118 = vector.broadcast %112 : vector<1x1xf32> to vector<8x1xf32>
    %119 = arith.divf %117, %118 : vector<8x1xf32>
    %cst_16 = arith.constant 0.000000e+00 : f32
    %120 = vector.broadcast %cst_16 : f32 to vector<8x1xf32>
    %121 = arith.select %116, %119, %120 : vector<8x1xi1>, vector<8x1xf32>
    %122 = vector.extract_strided_slice %111 {offsets = [5, 0], sizes = [1, 8], strides = [1, 1]} : vector<8x8xf32> to vector<1x8xf32>
    %123 = vector.broadcast %121 : vector<8x1xf32> to vector<8x8xf32>
    %124 = vector.broadcast %122 : vector<1x8xf32> to vector<8x8xf32>
    %125 = arith.mulf %123, %124 : vector<8x8xf32>
    %126 = arith.subf %111, %125 : vector<8x8xf32>
    %127 = vector.extract_strided_slice %126 {offsets = [6, 6], sizes = [1, 1], strides = [1, 1]} : vector<8x8xf32> to vector<1x1xf32>
    %128 = math.log %127 : vector<1x1xf32>
    %129 = arith.addf %114, %128 : vector<1x1xf32>
    %c6_i32 = arith.constant 6 : i32
    %130 = vector.broadcast %c6_i32 : i32 to vector<8x1xi32>
    %131 = arith.cmpi sgt, %7, %130 : vector<8x1xi32>
    %132 = vector.extract_strided_slice %126 {offsets = [0, 6], sizes = [8, 1], strides = [1, 1]} : vector<8x8xf32> to vector<8x1xf32>
    %133 = vector.broadcast %127 : vector<1x1xf32> to vector<8x1xf32>
    %134 = arith.divf %132, %133 : vector<8x1xf32>
    %cst_17 = arith.constant 0.000000e+00 : f32
    %135 = vector.broadcast %cst_17 : f32 to vector<8x1xf32>
    %136 = arith.select %131, %134, %135 : vector<8x1xi1>, vector<8x1xf32>
    %137 = vector.extract_strided_slice %126 {offsets = [6, 0], sizes = [1, 8], strides = [1, 1]} : vector<8x8xf32> to vector<1x8xf32>
    %138 = vector.broadcast %136 : vector<8x1xf32> to vector<8x8xf32>
    %139 = vector.broadcast %137 : vector<1x8xf32> to vector<8x8xf32>
    %140 = arith.mulf %138, %139 : vector<8x8xf32>
    %141 = arith.subf %126, %140 : vector<8x8xf32>
    %142 = vector.extract_strided_slice %141 {offsets = [7, 7], sizes = [1, 1], strides = [1, 1]} : vector<8x8xf32> to vector<1x1xf32>
    %143 = math.log %142 : vector<1x1xf32>
    %144 = arith.addf %129, %143 : vector<1x1xf32>
    %cst_18 = arith.constant 5.000000e-01 : f32
    %145 = vector.broadcast %cst_18 : f32 to vector<1x1xf32>
    %146 = arith.mulf %145, %144 : vector<1x1xf32>
    %cst_19 = arith.constant 11.3515081 : f32
    %147 = vector.broadcast %cst_19 : f32 to vector<1x1xf32>
    %148 = arith.addf %147, %146 : vector<1x1xf32>
    %cst_20 = arith.constant 0.000000e+00 : f32
    %149 = vector.broadcast %cst_20 : f32 to vector<1x1xf32>
    %150 = arith.subf %149, %148 : vector<1x1xf32>
    %c1_i32_21 = arith.constant 1 : i32
    %151 = vector.broadcast %c1_i32_21 : i32 to vector<16x1xi32>
    %152 = arith.cmpi eq, %1, %151 : vector<16x1xi32>
    %153 = arith.extui %152 : vector<16x1xi1> to vector<16x1xi32>
    %154 = arith.sitofp %153 : vector<16x1xi32> to vector<16x1xf32>
    %cst_22 = arith.constant dense<0.000000e+00> : vector<1xf32>
    %155 = vector.multi_reduction <add>, %154, %cst_22 [0] : vector<16x1xf32> to vector<1xf32>
    %156 = vector.shape_cast %155 : vector<1xf32> to vector<1x1xf32>
    %157 = vector.broadcast %154 : vector<16x1xf32> to vector<16x8xf32>
    %158 = arith.mulf %0, %157 : vector<16x8xf32>
    %cst_23 = arith.constant dense<0.000000e+00> : vector<8xf32>
    %159 = vector.multi_reduction <add>, %158, %cst_23 [0] : vector<16x8xf32> to vector<8xf32>
    %160 = vector.shape_cast %159 : vector<8xf32> to vector<1x8xf32>
    %cst_24 = arith.constant 1.000000e+00 : f32
    %161 = vector.broadcast %cst_24 : f32 to vector<1x1xf32>
    %162 = arith.maximumf %156, %161 : vector<1x1xf32>
    %163 = vector.broadcast %162 : vector<1x1xf32> to vector<1x8xf32>
    %164 = arith.divf %160, %163 : vector<1x8xf32>
    %165 = vector.broadcast %164 : vector<1x8xf32> to vector<16x8xf32>
    %166 = arith.subf %0, %165 : vector<16x8xf32>
    %167 = vector.broadcast %154 : vector<16x1xf32> to vector<16x8xf32>
    %168 = arith.mulf %166, %167 : vector<16x8xf32>
    %cst_25 = arith.constant dense<0.000000e+00> : vector<8x8xf32>
    %169 = tpu.matmul %168, %168, %cst_25 {dimension_numbers = #tpu.dot_dimension_numbers<[0], [0], [1], [1], [0, 1, 1, 1], [], []>, precision = #tpu.contract_precision<fp32>} : vector<16x8xf32>, vector<16x8xf32>, vector<8x8xf32> -> vector<8x8xf32>
    %cst_26 = arith.constant 1.000000e+00 : f32
    %170 = vector.broadcast %cst_26 : f32 to vector<1x1xf32>
    %171 = arith.subf %156, %170 : vector<1x1xf32>
    %cst_27 = arith.constant 1.000000e+00 : f32
    %172 = vector.broadcast %cst_27 : f32 to vector<1x1xf32>
    %173 = arith.maximumf %171, %172 : vector<1x1xf32>
    %174 = vector.broadcast %173 : vector<1x1xf32> to vector<8x8xf32>
    %175 = arith.divf %169, %174 : vector<8x8xf32>
    %cst_28 = arith.constant 5.000000e-04 : f32
    %176 = vector.broadcast %cst_28 : f32 to vector<8x8xf32>
    %177 = arith.mulf %176, %6 : vector<8x8xf32>
    %178 = arith.addf %175, %177 : vector<8x8xf32>
    %cst_29 = arith.constant 0.000000e+00 : f32
    %179 = vector.broadcast %cst_29 : f32 to vector<1x1xf32>
    %180 = vector.extract_strided_slice %178 {offsets = [0, 0], sizes = [1, 1], strides = [1, 1]} : vector<8x8xf32> to vector<1x1xf32>
    %181 = math.log %180 : vector<1x1xf32>
    %182 = arith.addf %179, %181 : vector<1x1xf32>
    %c0_i32_30 = arith.constant 0 : i32
    %183 = vector.broadcast %c0_i32_30 : i32 to vector<8x1xi32>
    %184 = arith.cmpi sgt, %7, %183 : vector<8x1xi32>
    %185 = vector.extract_strided_slice %178 {offsets = [0, 0], sizes = [8, 1], strides = [1, 1]} : vector<8x8xf32> to vector<8x1xf32>
    %186 = vector.broadcast %180 : vector<1x1xf32> to vector<8x1xf32>
    %187 = arith.divf %185, %186 : vector<8x1xf32>
    %cst_31 = arith.constant 0.000000e+00 : f32
    %188 = vector.broadcast %cst_31 : f32 to vector<8x1xf32>
    %189 = arith.select %184, %187, %188 : vector<8x1xi1>, vector<8x1xf32>
    %190 = vector.extract_strided_slice %178 {offsets = [0, 0], sizes = [1, 8], strides = [1, 1]} : vector<8x8xf32> to vector<1x8xf32>
    %191 = vector.broadcast %189 : vector<8x1xf32> to vector<8x8xf32>
    %192 = vector.broadcast %190 : vector<1x8xf32> to vector<8x8xf32>
    %193 = arith.mulf %191, %192 : vector<8x8xf32>
    %194 = arith.subf %178, %193 : vector<8x8xf32>
    %195 = vector.extract_strided_slice %194 {offsets = [1, 1], sizes = [1, 1], strides = [1, 1]} : vector<8x8xf32> to vector<1x1xf32>
    %196 = math.log %195 : vector<1x1xf32>
    %197 = arith.addf %182, %196 : vector<1x1xf32>
    %c1_i32_32 = arith.constant 1 : i32
    %198 = vector.broadcast %c1_i32_32 : i32 to vector<8x1xi32>
    %199 = arith.cmpi sgt, %7, %198 : vector<8x1xi32>
    %200 = vector.extract_strided_slice %194 {offsets = [0, 1], sizes = [8, 1], strides = [1, 1]} : vector<8x8xf32> to vector<8x1xf32>
    %201 = vector.broadcast %195 : vector<1x1xf32> to vector<8x1xf32>
    %202 = arith.divf %200, %201 : vector<8x1xf32>
    %cst_33 = arith.constant 0.000000e+00 : f32
    %203 = vector.broadcast %cst_33 : f32 to vector<8x1xf32>
    %204 = arith.select %199, %202, %203 : vector<8x1xi1>, vector<8x1xf32>
    %205 = vector.extract_strided_slice %194 {offsets = [1, 0], sizes = [1, 8], strides = [1, 1]} : vector<8x8xf32> to vector<1x8xf32>
    %206 = vector.broadcast %204 : vector<8x1xf32> to vector<8x8xf32>
    %207 = vector.broadcast %205 : vector<1x8xf32> to vector<8x8xf32>
    %208 = arith.mulf %206, %207 : vector<8x8xf32>
    %209 = arith.subf %194, %208 : vector<8x8xf32>
    %210 = vector.extract_strided_slice %209 {offsets = [2, 2], sizes = [1, 1], strides = [1, 1]} : vector<8x8xf32> to vector<1x1xf32>
    %211 = math.log %210 : vector<1x1xf32>
    %212 = arith.addf %197, %211 : vector<1x1xf32>
    %c2_i32_34 = arith.constant 2 : i32
    %213 = vector.broadcast %c2_i32_34 : i32 to vector<8x1xi32>
    %214 = arith.cmpi sgt, %7, %213 : vector<8x1xi32>
    %215 = vector.extract_strided_slice %209 {offsets = [0, 2], sizes = [8, 1], strides = [1, 1]} : vector<8x8xf32> to vector<8x1xf32>
    %216 = vector.broadcast %210 : vector<1x1xf32> to vector<8x1xf32>
    %217 = arith.divf %215, %216 : vector<8x1xf32>
    %cst_35 = arith.constant 0.000000e+00 : f32
    %218 = vector.broadcast %cst_35 : f32 to vector<8x1xf32>
    %219 = arith.select %214, %217, %218 : vector<8x1xi1>, vector<8x1xf32>
    %220 = vector.extract_strided_slice %209 {offsets = [2, 0], sizes = [1, 8], strides = [1, 1]} : vector<8x8xf32> to vector<1x8xf32>
    %221 = vector.broadcast %219 : vector<8x1xf32> to vector<8x8xf32>
    %222 = vector.broadcast %220 : vector<1x8xf32> to vector<8x8xf32>
    %223 = arith.mulf %221, %222 : vector<8x8xf32>
    %224 = arith.subf %209, %223 : vector<8x8xf32>
    %225 = vector.extract_strided_slice %224 {offsets = [3, 3], sizes = [1, 1], strides = [1, 1]} : vector<8x8xf32> to vector<1x1xf32>
    %226 = math.log %225 : vector<1x1xf32>
    %227 = arith.addf %212, %226 : vector<1x1xf32>
    %c3_i32_36 = arith.constant 3 : i32
    %228 = vector.broadcast %c3_i32_36 : i32 to vector<8x1xi32>
    %229 = arith.cmpi sgt, %7, %228 : vector<8x1xi32>
    %230 = vector.extract_strided_slice %224 {offsets = [0, 3], sizes = [8, 1], strides = [1, 1]} : vector<8x8xf32> to vector<8x1xf32>
    %231 = vector.broadcast %225 : vector<1x1xf32> to vector<8x1xf32>
    %232 = arith.divf %230, %231 : vector<8x1xf32>
    %cst_37 = arith.constant 0.000000e+00 : f32
    %233 = vector.broadcast %cst_37 : f32 to vector<8x1xf32>
    %234 = arith.select %229, %232, %233 : vector<8x1xi1>, vector<8x1xf32>
    %235 = vector.extract_strided_slice %224 {offsets = [3, 0], sizes = [1, 8], strides = [1, 1]} : vector<8x8xf32> to vector<1x8xf32>
    %236 = vector.broadcast %234 : vector<8x1xf32> to vector<8x8xf32>
    %237 = vector.broadcast %235 : vector<1x8xf32> to vector<8x8xf32>
    %238 = arith.mulf %236, %237 : vector<8x8xf32>
    %239 = arith.subf %224, %238 : vector<8x8xf32>
    %240 = vector.extract_strided_slice %239 {offsets = [4, 4], sizes = [1, 1], strides = [1, 1]} : vector<8x8xf32> to vector<1x1xf32>
    %241 = math.log %240 : vector<1x1xf32>
    %242 = arith.addf %227, %241 : vector<1x1xf32>
    %c4_i32_38 = arith.constant 4 : i32
    %243 = vector.broadcast %c4_i32_38 : i32 to vector<8x1xi32>
    %244 = arith.cmpi sgt, %7, %243 : vector<8x1xi32>
    %245 = vector.extract_strided_slice %239 {offsets = [0, 4], sizes = [8, 1], strides = [1, 1]} : vector<8x8xf32> to vector<8x1xf32>
    %246 = vector.broadcast %240 : vector<1x1xf32> to vector<8x1xf32>
    %247 = arith.divf %245, %246 : vector<8x1xf32>
    %cst_39 = arith.constant 0.000000e+00 : f32
    %248 = vector.broadcast %cst_39 : f32 to vector<8x1xf32>
    %249 = arith.select %244, %247, %248 : vector<8x1xi1>, vector<8x1xf32>
    %250 = vector.extract_strided_slice %239 {offsets = [4, 0], sizes = [1, 8], strides = [1, 1]} : vector<8x8xf32> to vector<1x8xf32>
    %251 = vector.broadcast %249 : vector<8x1xf32> to vector<8x8xf32>
    %252 = vector.broadcast %250 : vector<1x8xf32> to vector<8x8xf32>
    %253 = arith.mulf %251, %252 : vector<8x8xf32>
    %254 = arith.subf %239, %253 : vector<8x8xf32>
    %255 = vector.extract_strided_slice %254 {offsets = [5, 5], sizes = [1, 1], strides = [1, 1]} : vector<8x8xf32> to vector<1x1xf32>
    %256 = math.log %255 : vector<1x1xf32>
    %257 = arith.addf %242, %256 : vector<1x1xf32>
    %c5_i32_40 = arith.constant 5 : i32
    %258 = vector.broadcast %c5_i32_40 : i32 to vector<8x1xi32>
    %259 = arith.cmpi sgt, %7, %258 : vector<8x1xi32>
    %260 = vector.extract_strided_slice %254 {offsets = [0, 5], sizes = [8, 1], strides = [1, 1]} : vector<8x8xf32> to vector<8x1xf32>
    %261 = vector.broadcast %255 : vector<1x1xf32> to vector<8x1xf32>
    %262 = arith.divf %260, %261 : vector<8x1xf32>
    %cst_41 = arith.constant 0.000000e+00 : f32
    %263 = vector.broadcast %cst_41 : f32 to vector<8x1xf32>
    %264 = arith.select %259, %262, %263 : vector<8x1xi1>, vector<8x1xf32>
    %265 = vector.extract_strided_slice %254 {offsets = [5, 0], sizes = [1, 8], strides = [1, 1]} : vector<8x8xf32> to vector<1x8xf32>
    %266 = vector.broadcast %264 : vector<8x1xf32> to vector<8x8xf32>
    %267 = vector.broadcast %265 : vector<1x8xf32> to vector<8x8xf32>
    %268 = arith.mulf %266, %267 : vector<8x8xf32>
    %269 = arith.subf %254, %268 : vector<8x8xf32>
    %270 = vector.extract_strided_slice %269 {offsets = [6, 6], sizes = [1, 1], strides = [1, 1]} : vector<8x8xf32> to vector<1x1xf32>
    %271 = math.log %270 : vector<1x1xf32>
    %272 = arith.addf %257, %271 : vector<1x1xf32>
    %c6_i32_42 = arith.constant 6 : i32
    %273 = vector.broadcast %c6_i32_42 : i32 to vector<8x1xi32>
    %274 = arith.cmpi sgt, %7, %273 : vector<8x1xi32>
    %275 = vector.extract_strided_slice %269 {offsets = [0, 6], sizes = [8, 1], strides = [1, 1]} : vector<8x8xf32> to vector<8x1xf32>
    %276 = vector.broadcast %270 : vector<1x1xf32> to vector<8x1xf32>
    %277 = arith.divf %275, %276 : vector<8x1xf32>
    %cst_43 = arith.constant 0.000000e+00 : f32
    %278 = vector.broadcast %cst_43 : f32 to vector<8x1xf32>
    %279 = arith.select %274, %277, %278 : vector<8x1xi1>, vector<8x1xf32>
    %280 = vector.extract_strided_slice %269 {offsets = [6, 0], sizes = [1, 8], strides = [1, 1]} : vector<8x8xf32> to vector<1x8xf32>
    %281 = vector.broadcast %279 : vector<8x1xf32> to vector<8x8xf32>
    %282 = vector.broadcast %280 : vector<1x8xf32> to vector<8x8xf32>
    %283 = arith.mulf %281, %282 : vector<8x8xf32>
    %284 = arith.subf %269, %283 : vector<8x8xf32>
    %285 = vector.extract_strided_slice %284 {offsets = [7, 7], sizes = [1, 1], strides = [1, 1]} : vector<8x8xf32> to vector<1x1xf32>
    %286 = math.log %285 : vector<1x1xf32>
    %287 = arith.addf %272, %286 : vector<1x1xf32>
    %cst_44 = arith.constant 5.000000e-01 : f32
    %288 = vector.broadcast %cst_44 : f32 to vector<1x1xf32>
    %289 = arith.mulf %288, %287 : vector<1x1xf32>
    %cst_45 = arith.constant 11.3515081 : f32
    %290 = vector.broadcast %cst_45 : f32 to vector<1x1xf32>
    %291 = arith.addf %290, %289 : vector<1x1xf32>
    %cst_46 = arith.constant 0.000000e+00 : f32
    %292 = vector.broadcast %cst_46 : f32 to vector<1x1xf32>
    %293 = arith.subf %292, %291 : vector<1x1xf32>
    %294 = arith.addf %150, %293 : vector<1x1xf32>
    %cst_47 = arith.constant 2.000000e+00 : f32
    %295 = vector.broadcast %cst_47 : f32 to vector<1x1xf32>
    %296 = arith.divf %294, %295 : vector<1x1xf32>
    %cst_48 = arith.constant 9.99999997E-7 : f32
    %297 = vector.broadcast %cst_48 : f32 to vector<1x1xf32>
    %298 = arith.addf %296, %297 : vector<1x1xf32>
    %cst_49 = arith.constant 1.000000e+00 : f32
    %299 = vector.broadcast %cst_49 : f32 to vector<1x1xf32>
    %300 = arith.divf %299, %298 : vector<1x1xf32>
    %c0_50 = arith.constant 0 : index
    %c0_51 = arith.constant 0 : index
    %301 = vector.load %arg2[%c0_50, %c0_51] : memref<1x1xf32, #tpu.memory_space<vmem>>, vector<1x1xf32>
    tpu.vector_store %arg2[%c0_50, %c0_51], %300 {strides = array<i32>} : memref<1x1xf32, #tpu.memory_space<vmem>>, vector<1x1xf32>,
    return
  }
}

</mosaic_0001>

<bundles_post_ra>
// kernel: tpu_custom_call.1
= control target key start
LH: loop header
LB: loop body
LE: loop exit
PB: predicated region body
PF: predicated region fallthrough
CT: control target
= control target key end

     0   :  { %vm29_vm0 = vcmask 7168   ;;  %v1739_v2 = vmov 0   ;;  %v1740_v3 = vmov 0.0   ;;  %s1982_s0 = inlined_call_operand.vmem [shape: f32[16,8], index: 0, kind: input, shape index: {}]   ;;  %s1983_s1 = inlined_call_operand.vmem [shape: s32[16,1], index: 1, kind: input, shape index: {}]   ;;  %s1984_s2 = inlined_call_operand.hbm [shape: f32[1,1], index: 2, kind: output, shape index: {}]  }
   0x1   :  { %v14_v0 = vld [vmem:[%s1983_s1] sm:$0xff]  ;;  %v15_v1 = vld [vmem:[%s1983_s1 + $0x8] sm:$0xff]  ;;  %1624 = vset.pattern.permute.xlu0 %v1739_v2  ;;  %1630 = vset.pattern.permute.xlu1 %v1739_v2 }
   0x2   :  { %vm23_vm1 = vcmp.eq.s32.totalorder %v14_v0, 0  ;;  %vm24_vm2 = vcmp.eq.s32.totalorder %v15_v1, 0  ;;  %vm746_vm3 = vcmp.eq.s32.totalorder %v14_v0, 1  ;;  %vm747_vm4 = vcmp.eq.s32.totalorder %v15_v1, 1  ;;  %1523 = vmatprep.subr.mxu0 %v1740_v3  ;;  %1530 = vmatprep.subr.mxu1 %v1740_v3 }
   0x3   :  { %v1481_v4 = vsel %vm23_vm1, 1.0, %v1740_v3  ;;  %v1482_v5 = vsel %vm24_vm2, 1.0, %v1740_v3  ;;  %v1484_v6 = vsel %vm746_vm3, 1.0, %v1740_v3  ;;  %v1485_v7 = vsel %vm747_vm4, 1.0, %v1740_v3 }
   0x4   :  { %7 = vsyncpa [#allocation3], 0  ;;  %v31_v8 = vsel %vm29_vm0, %v1482_v5, 0.0  ;;  %v1625_v9 = vpack.i.bf16 %v1482_v5, %v1481_v4  ;;  %v30_v10 = vsel %vm29_vm0, %v1481_v4, 0.0  ;;  %v753_v11 = vsel %vm29_vm0, %v1485_v7, 0.0  ;;  %v12_v31 = vld [vmem:[%s1982_s0] sm:$0xff] }
   0x5   :  { %v32_v12 = vadd.f32 %v31_v8, %v30_v10  ;;  %v1631_v13 = vpack.i.bf16 %v1485_v7, %v1484_v6  ;;  %v752_v14 = vsel %vm29_vm0, %v1484_v6, 0.0  ;;  %v13_v32 = vld [vmem:[%s1982_s0 + $0x8] sm:$0xff]  ;;  %vm51_vm5 = vcmask 64512   ;;  %s1747_s0 = smov 127   ;;  %s1749_s16 = smov 126  }
   0x6   :  { %1626 = vperm.xlu0 %1624, %v1625_v9   ;;  %v754_v15 = vadd.f32 %v753_v11, %v752_v14  ;;  %vm1741_vm6 = vmmov 0   ;;  %vm105_vm7 = vcmask 130048   ;;  %s1750_s17 = smov 125   ;;  %s1751_s18 = smov 124   ;;  %vm1464_vm0 = vcmask 0  }
   0x7   :  { %v33_v16 = vrot.slane %v32_v12, 4  ;;  %1632 = vperm.xlu1 %1630, %v1631_v13   ;;  %1534 = vmatprep.mubr.msk.f32.mxu1 %vm1741_vm6, %v1740_v3  ;;  %s1752_s19 = smov 123   ;;  %s1753_s20 = smov 122  }
   0x8   :  { %v755_v17 = vrot.slane %v754_v15, 4  ;;  %1527 = vmatprep.mubr.msk.f32.mxu0 %vm1741_vm6, %v1740_v3  ;;  %s1754_s21 = smov 121   ;;  %s1755_s22 = smov [#allocation2]  }
   0x9   :  { %v34_v18 = vadd.f32 %v33_v16, %v32_v12  ;;  %s1472_s23 = sshll.u32 %s1755_s22, 4  ;;  %s1473_s23 = int_to_ptr.vmem [resolvable:$true] %s1472_s23 }
   0xa   :  { %v756_v19 = vadd.f32 %v755_v17, %v754_v15  ;;  %s1717_s24 = scalar_lea.vmem %s1473_s23, 16  ;;  %s1721_s25 = scalar_lea.vmem %s1473_s23, 32 }
   0xb   :  { %v35_v20 = vrot.slane %v34_v18, 2  ;;  %p1718_p0 = scmp.ne.s32.totalorder %s1473_s23, %s1717_s24  ;;  %p1722_p1 = scmp.lt.s32.totalorder %s1473_s23, %s1473_s23 }
   0xc   :  { %v757_v21 = vrot.slane %v756_v19, 2  ;;  %p1723_p2 = scmp.lt.s32.totalorder %s1721_s25, %s1717_s24 }
   0xd   :  { %v36_v22 = vadd.f32 %v35_v20, %v34_v18 }
   0xe   :  { %v758_v23 = vadd.f32 %v757_v21, %v756_v19  ;;  %p1724_p3 = por %p1723_p2, %p1722_p1 }
   0xf   :  { %v37_v24 = vrot.slane %v36_v22, 1 }
  0x10   :  { %v759_v25 = vrot.slane %v758_v23, 1  ;;  %p1725_p4 = pnand %p1724_p3, %p1718_p0 }
  0x11   :  { %v1787_v26 = vadd.f32 %v37_v24, %v36_v22 }
  0x12   :  { %v1789_v27 = vadd.f32 %v759_v25, %v758_v23 }
  0x13   :  { %v61_v28 = vmax.f32 %v1787_v26, 1.0  ;;  %v1483_v23 = vadd.f32 -1.0, %v1787_v26 }
  0x14   :  { %v782_v29 = vmax.f32 %v1789_v27, 1.0  ;;  %v1486_v21 = vadd.f32 -1.0, %v1789_v27 }
  0x15   :  { %64 = vperm.xlu0 %1624, %v61_v28   ;;  %v569_v24 = vmax.f32 %v1483_v23, 1.0 }
  0x16   :  { %785 = vperm.xlu1 %1630, %v782_v29   ;;  %v1289_v22 = vmax.f32 %v1486_v21, 1.0 }
  0x81   :  { %v1627_v30 = vpop.permute.xlu0 %1626 }
  0x82   :  { %v1629_v33 = vunpack.i.h.bf16 %v1627_v30  ;;  %v1628_v34 = vunpack.i.l.bf16 %v1627_v30  ;;  %v1633_v35 = vpop.permute.xlu1 %1632 }
  0x83   :  { %v1635_v36 = vunpack.i.h.bf16 %v1633_v35  ;;  %v1634_v37 = vunpack.i.l.bf16 %v1633_v35 }
  0x84   :  { %v49_v38 = vmul.f32 %v1628_v34, %v12_v31  ;;  %v50_v39 = vmul.f32 %v1629_v33, %v13_v32 }
  0x85   :  { %v771_v40 = vmul.f32 %v1634_v37, %v12_v31  ;;  %v772_v41 = vmul.f32 %v1635_v36, %v13_v32 }
  0x86   :  { %v52_v42 = vsel %vm51_vm5, %v49_v38, 0.0  ;;  %v53_v43 = vsel %vm51_vm5, %v50_v39, 0.0 }
  0x87   :  { %v54_v44 = vadd.f32 %v53_v43, %v52_v42  ;;  %v773_v45 = vsel %vm51_vm5, %v771_v40, 0.0  ;;  %v774_v46 = vsel %vm51_vm5, %v772_v41, 0.0 }
  0x88   :  { %v775_v47 = vadd.f32 %v774_v46, %v773_v45 }
  0x89   :  { %v55_v48 = vrot.slane %v54_v44, 4 }
  0x8a   :  { %v776_v49 = vrot.slane %v775_v47, 4 }
  0x8b   :  { %v56_v51 = vadd.f32 %v55_v48, %v54_v44 }
  0x8c   :  { %v777_v50 = vadd.f32 %v776_v49, %v775_v47 }
  0x8d   :  { %v57_v54 = vrot.slane %v56_v51, 2 }
  0x8e   :  { %v778_v52 = vrot.slane %v777_v50, 2 }
  0x8f   :  { %v58_v57 = vadd.f32 %v57_v54, %v56_v51 }
  0x90   :  { %v65_v53 = vpop.permute.xlu0 %64  ;;  %v779_v56 = vadd.f32 %v778_v52, %v777_v50 }
  0x91   :  { %v786_v55 = vpop.permute.xlu1 %785  ;;  %1647 = vrcp.f32 %v65_v53  ;;  %v59_v59 = vrot.slane %v58_v57, 1 }
  0x92   :  { %1649 = vrcp.f32 %v786_v55  ;;  %v780_v58 = vrot.slane %v779_v56, 1 }
  0x93   :  { %v60_v61 = vadd.f32 %v59_v59, %v58_v57 }
  0x94   :  { %v781_v60 = vadd.f32 %v780_v58, %v779_v56  ;;  %v16_v56 = vlaneseq }
  0x9e   :  { %v1648_v62 = vpop.eup %1647 }
  0x9f   :  { %v1650_v63 = vpop.eup %1649  ;;  %v68_v0 = vmul.f32 %v1648_v62, %v60_v61  ;;  %v19_v61 = vand.u32 127, %v16_v56 }
  0xa0   :  { %v789_v1 = vmul.f32 %v1650_v63, %v781_v60  ;;  %v1891_v60 = vshrl.u32 %v16_v56, 7 }
  0xa1   :  { %v69_v2 = vsub.f32 %v12_v31, %v68_v0  ;;  %v70_v4 = vsub.f32 %v13_v32, %v68_v0 }
  0xa2   :  { %v790_v5 = vsub.f32 %v12_v31, %v789_v1  ;;  %v791_v9 = vsub.f32 %v13_v32, %v789_v1  ;;  %vm20_vm8 = vcmp.eq.s32.totalorder %v1891_v60, %v19_v61  ;;  %vm582_vm9 = vcmp.gt.s32.totalorder %v1891_v60, 0 }
  0xa3   :  { %v71_v6 = vmul.f32 %v1628_v34, %v69_v2  ;;  %v72_v7 = vmul.f32 %v1629_v33, %v70_v4  ;;  %vm605_vm10 = vcmp.gt.s32.totalorder %v1891_v60, 1  ;;  %vm628_vm11 = vcmp.gt.s32.totalorder %v1891_v60, 2 }
  0xa4   :  { %v792_v8 = vmul.f32 %v1634_v37, %v790_v5  ;;  %v793_v14 = vmul.f32 %v1635_v36, %v791_v9  ;;  %v1480_v5 = vsel %vm20_vm8, 1.0, %v1740_v3  ;;  %vm651_vm12 = vcmp.gt.s32.totalorder %v1891_v60, 3 }
  0xa5   :  { %73 = vxpose.xlu0.b32.start [1/2] (short) (narrow) %v71_v6, 8  ;;  %v138_v10 = vand.u32 4294901760, %v72_v7  ;;  %v141_v11 = vand.u32 4294901760, %v71_v6  ;;  %vm674_vm13 = vcmp.gt.s32.totalorder %v1891_v60, 4  ;;  %vm697_vm14 = vcmp.gt.s32.totalorder %v1891_v60, 5 }
  0xa6   :  { %794 = vxpose.xlu1.b32.start [1/2] (short) (narrow) %v792_v8, 8  ;;  %v858_v25 = vand.u32 4294901760, %v793_v14  ;;  %v1821_v28 = vand.u32 4294901760, %v792_v8  ;;  %vm720_vm15 = vcmp.gt.s32.totalorder %v1891_v60, 6 }
  0xa7   :  { %1524 = vmatpush3.msra.mxu0 %v138_v10  ;;  %v1803_v12 = vsub.f32 %v72_v7, %v138_v10  ;;  %v1805_v13 = vsub.f32 %v71_v6, %v141_v11 }
  0xa8   :  { %1525 = vmatprep.subr.mxu0 %v1740_v3  ;;  %v1823_v29 = vsub.f32 %v793_v14, %v858_v25  ;;  %v1827_v32 = vsub.f32 %v792_v8, %v1821_v28 }
  0xa9   :  { %74 = vxpose.xlu0.b32.end [2/2] (short) (narrow) %v72_v7, 8  ;;  %1526 = vmatpush3.msra.mxu0 %v141_v11  ;;  %v217_v15 = vand.u32 4294901760, %v1803_v12  ;;  %v224_v16 = vand.u32 4294901760, %v1805_v13 }
  0xaa   :  { %795 = vxpose.xlu1.b32.end [2/2] (short) (narrow) %v793_v14, 8  ;;  %1537 = vmatprep.subr.mxu0 %v1740_v3  ;;  %v937_v34 = vand.u32 4294901760, %v1823_v29  ;;  %v944_v36 = vand.u32 4294901760, %v1827_v32 }
  0xab   :  { %v218_v17 = vsub.f32 %v1803_v12, %v217_v15  ;;  %v225_v18 = vsub.f32 %v1805_v13, %v224_v16 }
  0xac   :  { %v938_v38 = vsub.f32 %v1823_v29, %v937_v34  ;;  %v945_v41 = vsub.f32 %v1827_v32, %v944_v36 }
  0xad   :  { %v219_v19 = vand.u32 4294901760, %v218_v17  ;;  %v226_v20 = vand.u32 4294901760, %v225_v18 }
  0xae   :  { %v939_v43 = vand.u32 4294901760, %v938_v38  ;;  %v946_v44 = vand.u32 4294901760, %v945_v41  ;;  %v1742_v41 = vmov 1  }
  0xaf   :  { %1531 = vmatpush3.msra.mxu1 %v219_v19 }
  0xb0   :  { %1532 = vmatprep.subr.mxu1 %v1740_v3 }
  0xb1   :  { %1533 = vmatpush3.msra.mxu1 %v226_v20 }
  0xb2   :  { %1544 = vmatprep.subr.mxu1 %v1740_v3 }
  0xc8   :  { %1292 = vperm.xlu1 %1630, %v1289_v22  }
  0xd2   :  { %572 = vperm.xlu0 %1624, %v569_v24  }
 0x121   :  { %v89_v30 = vpop.trf.xlu0 }
 0x122   :  { %v107_v31 = vsel %vm105_vm7, %v89_v30, 0  ;;  %v810_v35 = vpop.trf.xlu1 }
 0x123   :  { %v176_v33 = vand.u32 4294901760, %v107_v31  ;;  %v827_v39 = vsel %vm105_vm7, %v810_v35, 0 }
 0x124   :  { %v896_v42 = vand.u32 4294901760, %v827_v39 }
 0x125   :  { %v177_v27 = vsub.f32 %v107_v31, %v176_v33  ;;  %1535 = vmatmul.mubr.f32.vlgmr.msra.gmra.mxu1 %v176_v33 }
 0x126   :  { %1545 = vmatpush3.msra.mxu1 %v138_v10  ;;  %1548 = vmatprep.mubr.msk.f32.mxu1 %vm1741_vm6, %v1740_v3  ;;  %v897_v45 = vsub.f32 %v827_v39, %v896_v42 }
 0x127   :  { %v178_v26 = vand.u32 4294901760, %v177_v27  ;;  %1546 = vmatprep.subr.mxu1 %v1740_v3 }
 0x128   :  { %1547 = vmatpush3.msra.mxu1 %v141_v11  ;;  %v898_v46 = vand.u32 4294901760, %v897_v45 }
 0x129   :  { %1558 = vmatprep.subr.mxu1 %v1740_v3  ;;  %1549 = vmatmul.mubr.f32.vlgmr.msra.gmra.mxu1 %v178_v26  ;;  %v179_v37 = vsub.f32 %v177_v27, %v178_v26 }
 0x12a   :  { %1559 = vmatpush3.msra.mxu1 %v138_v10  ;;  %1562 = vmatprep.mubr.msk.f32.mxu1 %vm1741_vm6, %v1740_v3  ;;  %v899_v47 = vsub.f32 %v897_v45, %v898_v46 }
 0x12b   :  { %1560 = vmatprep.subr.mxu1 %v1740_v3  ;;  %v180_v40 = vand.u32 4294901760, %v179_v37 }
 0x12c   :  { %1561 = vmatpush3.msra.mxu1 %v141_v11  ;;  %v900_v48 = vand.u32 4294901760, %v899_v47 }
 0x12d   :  { %1572 = vmatprep.subr.mxu1 %v1740_v3  ;;  %1528 = vmatmul.mubr.f32.vlgmr.msra.gmra.mxu0 %v180_v40 }
 0x12e   :  { %1538 = vmatpush3.msra.mxu0 %v1803_v12  ;;  %1563 = vmatmul.mubr.f32.vlgmr.msra.gmra.mxu1 %v176_v33  ;;  %v577_v12 = vmul.f32 0.0005, %v1480_v5 }
 0x12f   :  { %1573 = vmatpush3.msra.mxu1 %v939_v43  ;;  %1539 = vmatprep.subr.mxu0 %v1740_v3  ;;  %v608_v43 = vsub.s32 1, %v1891_v60 }
 0x130   :  { %1574 = vmatprep.subr.mxu1 %v1740_v3  ;;  %1540 = vmatpush3.msra.mxu0 %v1805_v13 }
 0x131   :  { %1575 = vmatpush3.msra.mxu1 %v946_v44  ;;  %1541 = vmatprep.mubr.msk.f32.mxu0 %vm1741_vm6, %v1740_v3 }
 0x132   :  { %1551 = vmatprep.subr.mxu0 %v1740_v3  ;;  %1576 = vmatprep.mubr.msk.f32.mxu1 %vm1741_vm6, %v1740_v3 }
 0x133   :  { %1586 = vmatprep.subr.mxu1 %v1740_v3  ;;  %1542 = vmatmul.mubr.f32.vlgmr.msra.gmra.mxu0 %v177_v27 }
 0x134   :  { %1552 = vmatpush3.msra.mxu0 %v217_v15  ;;  %1577 = vmatmul.mubr.f32.vlgmr.msra.gmra.mxu1 %v896_v42 }
 0x135   :  { %1587 = vmatpush3.msra.mxu1 %v858_v25  ;;  %1553 = vmatprep.subr.mxu0 %v1740_v3 }
 0x136   :  { %1588 = vmatprep.subr.mxu1 %v1740_v3  ;;  %1554 = vmatpush3.msra.mxu0 %v224_v16  ;;  %v585_v16 = vsub.s32 0, %v1891_v60 }
 0x137   :  { %1589 = vmatpush3.msra.mxu1 %v1821_v28  ;;  %1555 = vmatprep.mubr.msk.f32.mxu0 %vm1741_vm6, %v1740_v3 }
 0x138   :  { %1565 = vmatprep.subr.mxu0 %v1740_v3  ;;  %1590 = vmatprep.mubr.msk.f32.mxu1 %vm1741_vm6, %v1740_v3 }
 0x139   :  { %1600 = vmatprep.subr.mxu1 %v1740_v3  ;;  %1556 = vmatmul.mubr.f32.vlgmr.msra.gmra.mxu0 %v176_v33 }
 0x13a   :  { %1566 = vmatpush3.msra.mxu0 %v858_v25  ;;  %1591 = vmatmul.mubr.f32.vlgmr.msra.gmra.mxu1 %v898_v46 }
 0x13b   :  { %1601 = vmatpush3.msra.mxu1 %v858_v25  ;;  %1567 = vmatprep.subr.mxu0 %v1740_v3 }
 0x13c   :  { %1602 = vmatprep.subr.mxu1 %v1740_v3  ;;  %1568 = vmatpush3.msra.mxu0 %v1821_v28 }
 0x13d   :  { %1603 = vmatpush3.msra.mxu1 %v1821_v28  ;;  %1569 = vmatprep.mubr.msk.f32.mxu0 %vm1741_vm6, %v1740_v3 }
 0x13e   :  { %1579 = vmatprep.subr.mxu0 %v1740_v3  ;;  %1604 = vmatprep.mubr.msk.f32.mxu1 %vm1741_vm6, %v1740_v3 }
 0x13f   :  { %1570 = vmatmul.mubr.f32.vlgmr.msra.gmra.mxu0 %v900_v48  ;;  %1605 = vmatmul.mubr.f32.vlgmr.msra.gmra.mxu1 %v896_v42 }
 0x140   :  { %1580 = vmatpush3.msra.mxu0 %v1823_v29  ;;  %1583 = vmatprep.mubr.msk.f32.mxu0 %vm1741_vm6, %v1740_v3 }
 0x141   :  { %1581 = vmatprep.subr.mxu0 %v1740_v3 }
 0x142   :  { %1582 = vmatpush3.msra.mxu0 %v1827_v32 }
 0x143   :  { %1593 = vmatprep.subr.mxu0 %v1740_v3  ;;  %1584 = vmatmul.mubr.f32.vlgmr.msra.gmra.mxu0 %v897_v45  ;;  %v1293_v9 = vpop.permute.xlu1 %1292 }
 0x144   :  { %1594 = vmatpush3.msra.mxu0 %v937_v34  ;;  %1597 = vmatprep.mubr.msk.f32.mxu0 %vm1741_vm6, %v1740_v3 }
 0x145   :  { %1595 = vmatprep.subr.mxu0 %v1740_v3 }
 0x146   :  { %1596 = vmatpush3.msra.mxu0 %v944_v36 }
 0x147   :  { %1598 = vmatmul.mubr.f32.vlgmr.msra.gmra.mxu0 %v896_v42 }
 0x14d   :  { %v573_v53 = vpop.permute.xlu0 %572 }
 0x14e   :  { %1651 = vrcp.f32 %v573_v53 }
 0x14f   :  { %1653 = vrcp.f32 %v1293_v9 }
 0x15b   :  { %v1652_v14 = vpop.eup %1651 }
 0x15c   :  { %v1654_v33 = vpop.eup %1653 }
 0x1e5   :  { %v263_v49 = vpop.f32.mrf.mxu1 }
 0x1e7   :  { %v1536_v50 = vpop.f32.mrf.mxu1 }
 0x1e9   :  { %v414_v51 = vpop.f32.mrf.mxu1 }
 0x1eb   :  { %v1550_v52 = vpop.f32.mrf.mxu1 }
 0x1ed   :  { %v182_v54 = vpop.f32.mrf.mxu0 }
 0x1ee   :  { %v564_v55 = vpop.f32.mrf.mxu1  ;;  %v264_v59 = vadd.f32 %v263_v49, %v182_v54 }
 0x1ef   :  { %v1529_v57 = vpop.f32.mrf.mxu0 }
 0x1f0   :  { %v1564_v58 = vpop.f32.mrf.mxu1  ;;  %v1743_v57 = vmov 2  }
 0x1f3   :  { %v339_v62 = vpop.f32.mrf.mxu0 }
 0x1f4   :  { %v340_v63 = vadd.f32 %v339_v62, %v264_v59  ;;  %v983_v0 = vpop.f32.mrf.mxu1  ;;  %v631_v59 = vsub.s32 2, %v1891_v60 }
 0x1f5   :  { %v1543_v1 = vpop.f32.mrf.mxu0 }
 0x1f6   :  { %v1578_v2 = vpop.f32.mrf.mxu1  ;;  %v415_v4 = vadd.f32 %v414_v51, %v340_v63 }
 0x1f9   :  { %v491_v6 = vpop.f32.mrf.mxu0 }
 0x1fa   :  { %v492_v7 = vadd.f32 %v491_v6, %v415_v4  ;;  %v1134_v8 = vpop.f32.mrf.mxu1 }
 0x1fb   :  { %v1557_v10 = vpop.f32.mrf.mxu0 }
 0x1fc   :  { %v565_v11 = vadd.f32 %v564_v55, %v492_v7  ;;  %v1592_v13 = vpop.f32.mrf.mxu1 }
 0x1fd   :  { %v654_v13 = vsub.s32 3, %v1891_v60 }
 0x1fe   :  { %v576_v15 = vmul.f32 %v1652_v14, %v565_v11  ;;  %v1744_v11 = vmov 3  }
 0x1ff   :  { %v902_v17 = vpop.f32.mrf.mxu0  ;;  %v1284_v18 = vpop.f32.mrf.mxu1 }
 0x200   :  { %v1896_v19 = vadd.f32 %v577_v12, %v576_v15  ;;  %v984_v22 = vadd.f32 %v983_v0, %v902_v17 }
 0x201   :  { %v1571_v20 = vpop.f32.mrf.mxu0  ;;  %v1606_v21 = vpop.f32.mrf.mxu1 }
 0x202   :  { %v586_v3 = vrot.slane %v1896_v19, %v585_v16 }
 0x203   :  { %v1059_v23 = vpop.f32.mrf.mxu0 }
 0x204   :  { %1655 = vrcp.f32 %v586_v3  ;;  %v1060_v24 = vadd.f32 %v1059_v23, %v984_v22 }
 0x205   :  { %v1585_v25 = vpop.f32.mrf.mxu0 }
 0x206   :  { %v1135_v28 = vadd.f32 %v1134_v8, %v1060_v24 }
 0x207   :  { %v1211_v29 = vpop.f32.mrf.mxu0 }
 0x208   :  { %v1212_v30 = vadd.f32 %v1211_v29, %v1135_v28  ;;  %v1745_v29 = vmov 4  }
 0x209   :  { %v1599_v31 = vpop.f32.mrf.mxu0 }
 0x20a   :  { %v1285_v32 = vadd.f32 %v1284_v18, %v1212_v30  ;;  %v677_v31 = vsub.s32 4, %v1891_v60 }
 0x20c   :  { %v1296_v27 = vmul.f32 %v1654_v33, %v1285_v32 }
 0x20e   :  { %v1899_v34 = vadd.f32 %v1296_v27, %v577_v12 }
 0x210   :  { %v1304_v26 = vrot.slane %v1899_v34, %v585_v16 }
 0x211   :  { %v1656_v35 = vpop.eup %1655 }
 0x212   :  { %1657 = vrcp.f32 %v1304_v26  ;;  %v588_v36 = vmul.f32 %v1656_v35, %v1896_v19 }
 0x214   :  { %v589_v37 = vsel %vm582_vm9, %v588_v36, 0.0 }
 0x215   :  { %592 = vperm.xlu0 %1624, %v589_v37  }
 0x219   :  { %1636 = vset.pattern.permute.xlu0 %v1742_v41 }
 0x21f   :  { %v1658_v38 = vpop.eup %1657 }
 0x220   :  { %v1306_v39 = vmul.f32 %v1658_v38, %v1899_v34 }
 0x222   :  { %v1307_v40 = vsel %vm582_vm9, %v1306_v39, 0.0 }
 0x223   :  { %1310 = vperm.xlu1 %1630, %v1307_v40  }
 0x227   :  { %1637 = vset.pattern.permute.xlu1 %v1742_v41 }
 0x290   :  { %v593_v42 = vpop.permute.xlu0 %592 }
 0x291   :  { %v595_v44 = vmul.f32 %v593_v42, %v586_v3 }
 0x293   :  { %v1907_v45 = vsub.f32 %v1896_v19, %v595_v44  ;;  %v1746_v44 = vmov 5  }
 0x295   :  { %v609_v46 = vrot.slane %v1907_v45, %v608_v43 }
 0x297   :  { %1659 = vrcp.f32 %v609_v46 }
 0x29e   :  { %v1311_v47 = vpop.permute.xlu1 %1310 }
 0x29f   :  { %v1313_v48 = vmul.f32 %v1311_v47, %v1304_v26  ;;  %v700_v47 = vsub.s32 5, %v1891_v60 }
 0x2a1   :  { %v1911_v49 = vsub.f32 %v1899_v34, %v1313_v48 }
 0x2a3   :  { %v1326_v50 = vrot.slane %v1911_v49, %v608_v43 }
 0x2a4   :  { %v1660_v51 = vpop.eup %1659 }
 0x2a5   :  { %1661 = vrcp.f32 %v1326_v50  ;;  %v611_v52 = vmul.f32 %v1660_v51, %v1907_v45 }
 0x2a7   :  { %v612_v53 = vsel %vm605_vm10, %v611_v52, 0.0 }
 0x2a8   :  { %615 = vperm.xlu0 %1636, %v612_v53  }
 0x2ac   :  { %1639 = vset.pattern.permute.xlu0 %v1743_v57 }
 0x2b2   :  { %v1662_v54 = vpop.eup %1661 }
 0x2b3   :  { %v1328_v55 = vmul.f32 %v1662_v54, %v1911_v49 }
 0x2b5   :  { %v1329_v56 = vsel %vm605_vm10, %v1328_v55, 0.0 }
 0x2b6   :  { %1332 = vperm.xlu1 %1637, %v1329_v56  }
 0x2ba   :  { %1638 = vset.pattern.permute.xlu1 %v1743_v57 }
 0x323   :  { %v616_v58 = vpop.permute.xlu0 %615 }
 0x324   :  { %v618_v61 = vmul.f32 %v616_v58, %v609_v46 }
 0x326   :  { %v1919_v62 = vsub.f32 %v1907_v45, %v618_v61 }
 0x328   :  { %v632_v63 = vrot.slane %v1919_v62, %v631_v59 }
 0x32a   :  { %1663 = vrcp.f32 %v632_v63 }
 0x331   :  { %v1333_v0 = vpop.permute.xlu1 %1332 }
 0x332   :  { %v1335_v1 = vmul.f32 %v1333_v0, %v1326_v50 }
 0x334   :  { %v1923_v2 = vsub.f32 %v1911_v49, %v1335_v1 }
 0x336   :  { %v1348_v4 = vrot.slane %v1923_v2, %v631_v59 }
 0x337   :  { %v1664_v5 = vpop.eup %1663 }
 0x338   :  { %1665 = vrcp.f32 %v1348_v4  ;;  %v634_v6 = vmul.f32 %v1664_v5, %v1919_v62 }
 0x33a   :  { %v635_v7 = vsel %vm628_vm11, %v634_v6, 0.0 }
 0x33b   :  { %638 = vperm.xlu1 %1638, %v635_v7   ;;  %v1748_v7 = vmov 6  }
 0x33f   :  { %1640 = vset.pattern.permute.xlu1 %v1744_v11 }
 0x345   :  { %v1666_v8 = vpop.eup %1665 }
 0x346   :  { %v1350_v9 = vmul.f32 %v1666_v8, %v1923_v2 }
 0x348   :  { %v1351_v10 = vsel %vm628_vm11, %v1350_v9, 0.0 }
 0x349   :  { %1354 = vperm.xlu0 %1639, %v1351_v10  }
 0x34d   :  { %1641 = vset.pattern.permute.xlu0 %v1745_v29 }
 0x3b6   :  { %v639_v12 = vpop.permute.xlu1 %638 }
 0x3b7   :  { %v641_v14 = vmul.f32 %v639_v12, %v632_v63 }
 0x3b9   :  { %v642_v15 = vsub.f32 %v1919_v62, %v641_v14 }
 0x3bb   :  { %v655_v16 = vrot.slane %v642_v15, %v654_v13 }
 0x3bd   :  { %1667 = vrcp.f32 %v655_v16 }
 0x3c4   :  { %v1355_v17 = vpop.permute.xlu0 %1354 }
 0x3c5   :  { %v1357_v18 = vmul.f32 %v1355_v17, %v1348_v4  ;;  %v723_v17 = vsub.s32 6, %v1891_v60 }
 0x3c7   :  { %v1932_v20 = vsub.f32 %v1923_v2, %v1357_v18 }
 0x3c9   :  { %v1370_v21 = vrot.slane %v1932_v20, %v654_v13 }
 0x3ca   :  { %v1668_v3 = vpop.eup %1667 }
 0x3cb   :  { %1669 = vrcp.f32 %v1370_v21  ;;  %v657_v22 = vmul.f32 %v1668_v3, %v642_v15 }
 0x3cd   :  { %v658_v23 = vsel %vm651_vm12, %v657_v22, 0.0 }
 0x3ce   :  { %661 = vperm.xlu1 %1640, %v658_v23  }
 0x3d8   :  { %v1670_v24 = vpop.eup %1669 }
 0x3d9   :  { %v1372_v25 = vmul.f32 %v1670_v24, %v1932_v20 }
 0x3db   :  { %v1373_v28 = vsel %vm651_vm12, %v1372_v25, 0.0 }
 0x3dc   :  { %1376 = vperm.xlu1 %1640, %v1373_v28  }
 0x3e0   :  { %1642 = vset.pattern.permute.xlu1 %v1745_v29 }
 0x449   :  { %v662_v30 = vpop.permute.xlu1 %661 }
 0x44a   :  { %v664_v32 = vmul.f32 %v662_v30, %v655_v16 }
 0x44c   :  { %v665_v33 = vsub.f32 %v642_v15, %v664_v32 }
 0x44e   :  { %v678_v27 = vrot.slane %v665_v33, %v677_v31 }
 0x450   :  { %1671 = vrcp.f32 %v678_v27 }
 0x457   :  { %v1377_v26 = vpop.permute.xlu1 %1376 }
 0x458   :  { %v1379_v35 = vmul.f32 %v1377_v26, %v1370_v21 }
 0x45a   :  { %v1939_v36 = vsub.f32 %v1932_v20, %v1379_v35 }
 0x45c   :  { %v1392_v37 = vrot.slane %v1939_v36, %v677_v31 }
 0x45d   :  { %v1672_v38 = vpop.eup %1671 }
 0x45e   :  { %1673 = vrcp.f32 %v1392_v37  ;;  %v680_v39 = vmul.f32 %v1672_v38, %v665_v33 }
 0x460   :  { %v681_v40 = vsel %vm674_vm13, %v680_v39, 0.0 }
 0x461   :  { %684 = vperm.xlu0 %1641, %v681_v40  }
 0x465   :  { %1644 = vset.pattern.permute.xlu0 %v1746_v44 }
 0x46b   :  { %v1674_v41 = vpop.eup %1673 }
 0x46c   :  { %v1394_v42 = vmul.f32 %v1674_v41, %v1939_v36 }
 0x46e   :  { %v1395_v43 = vsel %vm674_vm13, %v1394_v42, 0.0 }
 0x46f   :  { %1398 = vperm.xlu1 %1642, %v1395_v43  }
 0x473   :  { %1643 = vset.pattern.permute.xlu1 %v1746_v44 }
 0x4dc   :  { %v685_v46 = vpop.permute.xlu0 %684 }
 0x4dd   :  { %v687_v48 = vmul.f32 %v685_v46, %v678_v27 }
 0x4df   :  { %v688_v50 = vsub.f32 %v665_v33, %v687_v48 }
 0x4e1   :  { %v701_v51 = vrot.slane %v688_v50, %v700_v47 }
 0x4e3   :  { %1675 = vrcp.f32 %v701_v51 }
 0x4e4   :  { %1677 = vlog2.f32 %v1907_v45 }
 0x4ea   :  { %v1399_v52 = vpop.permute.xlu1 %1398 }
 0x4eb   :  { %v1401_v53 = vmul.f32 %v1399_v52, %v1392_v37 }
 0x4ed   :  { %v1946_v54 = vsub.f32 %v1939_v36, %v1401_v53 }
 0x4ef   :  { %v1414_v55 = vrot.slane %v1946_v54, %v700_v47 }
 0x4f0   :  { %v1676_v56 = vpop.eup %1675 }
 0x4f1   :  { %1679 = vrcp.f32 %v1414_v55  ;;  %v703_v57 = vmul.f32 %v1676_v56, %v688_v50  ;;  %v1678_v59 = vpop.eup %1677 }
 0x4f2   :  { %1681 = vlog2.f32 %v1919_v62  ;;  %v598_v0 = vmul.f32 0.6931472, %v1678_v59 }
 0x4f3   :  { %v704_v58 = vsel %vm697_vm14, %v703_v57, 0.0  ;;  %1683 = vlog2.f32 %v642_v15 }
 0x4f4   :  { %707 = vperm.xlu1 %1643, %v704_v58   ;;  %1685 = vlog2.f32 %v665_v33  ;;  %v600_v5 = vrot.slane %v598_v0, 1 }
 0x4f5   :  { %1687 = vlog2.f32 %v688_v50 }
 0x4f8   :  { %1645 = vset.pattern.permute.xlu1 %v1748_v7 }
 0x4fe   :  { %v1680_v61 = vpop.eup %1679 }
 0x4ff   :  { %v1416_v63 = vmul.f32 %v1680_v61, %v1946_v54  ;;  %v1682_v1 = vpop.eup %1681 }
 0x500   :  { %v621_v6 = vmul.f32 0.6931472, %v1682_v1  ;;  %v1684_v45 = vpop.eup %1683 }
 0x501   :  { %v1417_v4 = vsel %vm697_vm14, %v1416_v63, 0.0  ;;  %v644_v8 = vmul.f32 0.6931472, %v1684_v45  ;;  %v1686_v9 = vpop.eup %1685 }
 0x502   :  { %1420 = vperm.xlu0 %1644, %v1417_v4   ;;  %v623_v62 = vrot.slane %v621_v6, 2  ;;  %v667_v11 = vmul.f32 0.6931472, %v1686_v9  ;;  %v1688_v12 = vpop.eup %1687 }
 0x503   :  { %v646_v10 = vrot.slane %v644_v8, 3  ;;  %v690_v14 = vmul.f32 0.6931472, %v1688_v12 }
 0x504   :  { %v669_v13 = vrot.slane %v667_v11, 4 }
 0x505   :  { %v692_v15 = vrot.slane %v690_v14, 5 }
 0x506   :  { %601 = vrot.lane.b32.xlu0 %v600_v5, %s1747_s0 }
 0x507   :  { %1646 = vset.pattern.permute.xlu0 %v1748_v7 }
 0x50a   :  { %624 = vrot.lane.b32.xlu0 %v623_v62, %s1749_s16 }
 0x50e   :  { %647 = vrot.lane.b32.xlu0 %v646_v10, %s1750_s17 }
 0x512   :  { %670 = vrot.lane.b32.xlu0 %v669_v13, %s1751_s18 }
 0x516   :  { %693 = vrot.lane.b32.xlu0 %v692_v15, %s1752_s19 }
 0x56f   :  { %v708_v16 = vpop.permute.xlu1 %707 }
 0x570   :  { %v710_v18 = vmul.f32 %v708_v16, %v701_v51 }
 0x572   :  { %v711_v21 = vsub.f32 %v688_v50, %v710_v18 }
 0x574   :  { %v724_v3 = vrot.slane %v711_v21, %v723_v17  ;;  %1689 = vlog2.f32 %v711_v21 }
 0x576   :  { %1691 = vrcp.f32 %v724_v3 }
 0x577   :  { %1693 = vlog2.f32 %v1911_v49 }
 0x57d   :  { %v1421_v22 = vpop.permute.xlu0 %1420 }
 0x57e   :  { %v1423_v23 = vmul.f32 %v1421_v22, %v1414_v55 }
 0x580   :  { %v1424_v24 = vsub.f32 %v1946_v54, %v1423_v23 }
 0x581   :  { %v1690_v25 = vpop.eup %1689  ;;  %v602_v4 = vpop.permute.xlu0 %601 }
 0x582   :  { %v1436_v28 = vrot.slane %v1424_v24, %v723_v17  ;;  %v713_v29 = vmul.f32 0.6931472, %v1690_v25 }
 0x583   :  { %v1692_v30 = vpop.eup %1691 }
 0x584   :  { %1695 = vrcp.f32 %v1436_v28  ;;  %v715_v31 = vrot.slane %v713_v29, 6  ;;  %v726_v32 = vmul.f32 %v1692_v30, %v711_v21  ;;  %v1694_v27 = vpop.eup %1693 }
 0x585   :  { %1697 = vlog2.f32 %v1923_v2  ;;  %v1316_v49 = vmul.f32 0.6931472, %v1694_v27  ;;  %v625_v5 = vpop.permute.xlu0 %624 }
 0x586   :  { %716 = vrot.lane.b32.xlu0 %v715_v31, %s1753_s20  ;;  %v727_v33 = vsel %vm720_vm15, %v726_v32, 0.0  ;;  %1699 = vlog2.f32 %v1932_v20 }
 0x587   :  { %730 = vperm.xlu1 %1645, %v727_v33   ;;  %1701 = vlog2.f32 %v1939_v36  ;;  %v1318_v39 = vrot.slane %v1316_v49, 1 }
 0x588   :  { %1703 = vlog2.f32 %v1946_v54 }
 0x589   :  { %1705 = vlog2.f32 %v1424_v24  ;;  %v648_v45 = vpop.permute.xlu0 %647 }
 0x58d   :  { %v671_v8 = vpop.permute.xlu0 %670 }
 0x591   :  { %v1696_v26 = vpop.eup %1695  ;;  %v694_v13 = vpop.permute.xlu0 %693 }
 0x592   :  { %v1438_v35 = vmul.f32 %v1696_v26, %v1424_v24  ;;  %v1698_v37 = vpop.eup %1697 }
 0x593   :  { %v1338_v40 = vmul.f32 0.6931472, %v1698_v37  ;;  %v1700_v41 = vpop.eup %1699 }
 0x594   :  { %v1439_v38 = vsel %vm720_vm15, %v1438_v35, 0.0  ;;  %v1360_v20 = vmul.f32 0.6931472, %v1700_v41  ;;  %v1702_v36 = vpop.eup %1701 }
 0x595   :  { %1442 = vperm.xlu1 %1645, %v1439_v38   ;;  %v1340_v2 = vrot.slane %v1338_v40, 2  ;;  %v1382_v43 = vmul.f32 0.6931472, %v1702_v36  ;;  %v1704_v44 = vpop.eup %1703 }
 0x596   :  { %v1362_v42 = vrot.slane %v1360_v20, 3  ;;  %v1404_v60 = vmul.f32 0.6931472, %v1704_v44  ;;  %v1706_v47 = vpop.eup %1705 }
 0x597   :  { %v1384_v46 = vrot.slane %v1382_v43, 4  ;;  %v1426_v50 = vmul.f32 0.6931472, %v1706_v47 }
 0x598   :  { %v1406_v48 = vrot.slane %v1404_v60, 5 }
 0x599   :  { %1319 = vrot.lane.b32.xlu1 %v1318_v39, %s1747_s0  ;;  %v1428_v51 = vrot.slane %v1426_v50, 6 }
 0x59d   :  { %1341 = vrot.lane.b32.xlu1 %v1340_v2, %s1749_s16 }
 0x5a1   :  { %1363 = vrot.lane.b32.xlu1 %v1362_v42, %s1750_s17 }
 0x5a5   :  { %1385 = vrot.lane.b32.xlu1 %v1384_v46, %s1751_s18 }
 0x5a9   :  { %1407 = vrot.lane.b32.xlu1 %v1406_v48, %s1752_s19 }
 0x5ad   :  { %1429 = vrot.lane.b32.xlu1 %v1428_v51, %s1753_s20 }
 0x5f8   :  { %v717_v18 = vpop.permute.xlu0 %716 }
 0x602   :  { %v731_v52 = vpop.permute.xlu1 %730 }
 0x603   :  { %v733_v53 = vmul.f32 %v731_v52, %v724_v3 }
 0x605   :  { %v734_v54 = vsub.f32 %v711_v21, %v733_v53 }
 0x607   :  { %1707 = vlog2.f32 %v734_v54 }
 0x610   :  { %v1443_v55 = vpop.permute.xlu1 %1442 }
 0x611   :  { %v1445_v56 = vmul.f32 %v1443_v55, %v1436_v28 }
 0x613   :  { %v1446_v57 = vsub.f32 %v1424_v24, %v1445_v56 }
 0x614   :  { %v1708_v58 = vpop.eup %1707  ;;  %v1320_v6 = vpop.permute.xlu1 %1319 }
 0x615   :  { %1709 = vlog2.f32 %v1446_v57  ;;  %v736_v59 = vmul.f32 0.6931472, %v1708_v58 }
 0x616   :  { %1711 = vlog2.f32 %v1896_v19 }
 0x617   :  { %v738_v61 = vrot.slane %v736_v59, 7  ;;  %1713 = vlog2.f32 %v1899_v34 }
 0x618   :  { %v1342_v7 = vpop.permute.xlu1 %1341 }
 0x619   :  { %739 = vrot.lane.b32.xlu0 %v738_v61, %s1754_s21 }
 0x61c   :  { %v1364_v9 = vpop.permute.xlu1 %1363 }
 0x620   :  { %v1386_v14 = vpop.permute.xlu1 %1385 }
 0x622   :  { %v1710_v63 = vpop.eup %1709 }
 0x623   :  { %v1448_v0 = vmul.f32 0.6931472, %v1710_v63  ;;  %v1712_v62 = vpop.eup %1711 }
 0x624   :  { %v580_v10 = vmul.f32 0.6931472, %v1712_v62  ;;  %v1714_v12 = vpop.eup %1713  ;;  %v1408_v3 = vpop.permute.xlu1 %1407 }
 0x625   :  { %v1450_v1 = vrot.slane %v1448_v0, 7  ;;  %v1299_v17 = vmul.f32 0.6931472, %v1714_v12 }
 0x626   :  { %v604_v11 = vadd.f32 %v602_v4, %v580_v10 }
 0x627   :  { %1451 = vrot.lane.b32.xlu1 %v1450_v1, %s1754_s21  ;;  %v1322_v19 = vadd.f32 %v1320_v6, %v1299_v17 }
 0x628   :  { %v627_v15 = vadd.f32 %v625_v5, %v604_v11  ;;  %v1430_v30 = vpop.permute.xlu1 %1429 }
 0x629   :  { %v1344_v23 = vadd.f32 %v1342_v7, %v1322_v19 }
 0x62a   :  { %v650_v16 = vadd.f32 %v648_v45, %v627_v15 }
 0x62b   :  { %v1366_v25 = vadd.f32 %v1364_v9, %v1344_v23 }
 0x62c   :  { %v673_v21 = vadd.f32 %v671_v8, %v650_v16 }
 0x62d   :  { %v1388_v28 = vadd.f32 %v1386_v14, %v1366_v25 }
 0x62e   :  { %v696_v22 = vadd.f32 %v694_v13, %v673_v21 }
 0x62f   :  { %v1410_v31 = vadd.f32 %v1408_v3, %v1388_v28 }
 0x630   :  { %v719_v24 = vadd.f32 %v717_v18, %v696_v22 }
 0x631   :  { %v1432_v32 = vadd.f32 %v1430_v30, %v1410_v31 }
 0x68b   :  { %v740_v34 = vpop.permute.xlu0 %739 }
 0x68c   :  { %v742_v29 = vadd.f32 %v740_v34, %v719_v24 }
 0x68e   :  { %v743_v33 = vmul.f32 0.5, %v742_v29 }
 0x690   :  { %v744_v35 = vadd.f32 11.351508, %v743_v33 }
 0x692   :  { %v745_v38 = vsub.f32 0.0, %v744_v35 }
 0x699   :  { %v1452_v27 = vpop.permute.xlu1 %1451 }
 0x69a   :  { %v1454_v26 = vadd.f32 %v1452_v27, %v1432_v32 }
 0x69c   :  { %v1455_v49 = vmul.f32 0.5, %v1454_v26 }
 0x69e   :  { %v1456_v37 = vadd.f32 11.351508, %v1455_v49 }
 0x6a0   :  { %v1457_v39 = vsub.f32 0.0, %v1456_v37 }
 0x6a2   :  { %v1458_v40 = vadd.f32 %v1457_v39, %v745_v38 }
 0x6a4   :  { %v1460_v41 = vmul.f32 0.5, %v1458_v40 }
 0x6a6   :  { %v1461_v2 = vadd.f32 1e-06, %v1460_v41 }
 0x6a8   :  { %1715 = vrcp.f32 %v1461_v2 }
 0x6b5   :  { %v1716_v20 = vpop.eup %1715 }
 0x6b6   :  { %1465 = vst.msk [vmem:[#allocation2] sm:$0x1] %vm1464_vm0, %v1716_v20 }
 0x6b7   :  { %1728 = shalt.err (!%p1725_p4)
}
 0x6b8   :  { %1475 = dma.vmem_to_hbm [thread:$0]  %s1473_s23, 16, %s1984_s2, [#allocation3]  }
 0x6b9   :  { %1737 = dma.done.wait [#allocation3], 16  }
 0x6ba   :  { %1738 = vsyncadd [#allocation3], 4294967280 }
 0x6bb   :  { %1479 = vsyncpa [#allocation3], 1 }

</bundles_post_ra>
